<compile_context>
chip_gen: v6e
topology: v6e:2x2x1
jax: 0.10.0
libtpu: 0.0.40
codegen_flags: <defaults>
</compile_context>

<pallas_src>
from functools import partial

import jax
import jax.numpy as jnp
from jax.experimental import pallas as pl
from jax.experimental.pallas import tpu as pltpu

LANE = 128          # pad every feature dim to a multiple of this
SUBLANE = 8         # batch tile must be a multiple of this
MAX_TILE_B = 1024   # batch rows per grid step (cap)


def _round_up(n, m):
    return (n + m - 1) // m * m


def _pad_to(a, shape):
    pads = [(0, t - s) for s, t in zip(a.shape, shape)]
    return jnp.pad(a, pads)


def teacher_mlp_kernel(x_ref, w1_ref, b1_ref, w2_ref, b2_ref, w3_ref, b3_ref,
                       o_ref):
    # fc1 + ReLU  (bf16 operands, f32 accumulate / elementwise)
    h1 = jnp.dot(x_ref[...], w1_ref[...], preferred_element_type=jnp.float32)
    h1 = jnp.maximum(h1 + b1_ref[...], 0.0)

    # fc2 + ReLU
    h2 = jnp.dot(h1.astype(w2_ref.dtype), w2_ref[...],
                 preferred_element_type=jnp.float32)
    h2 = jnp.maximum(h2 + b2_ref[...], 0.0)

    # fc3 (logits, no activation)
    out = jnp.dot(h2.astype(w3_ref.dtype), w3_ref[...],
                  preferred_element_type=jnp.float32)
    o_ref[...] = (out + b3_ref[...]).astype(o_ref.dtype)


@partial(jax.jit, static_argnames=())
def teacher_model_forward(x, params):
    """x: [B, input_dim] float32. params: dict of w1,b1,w2,b2,w3,b3 (f32,
    weights stored [in, out], biases [1, out]). Returns [B, output_dim] f32."""
    w1, b1 = params["w1"], params["b1"]
    w2, b2 = params["w2"], params["b2"]
    w3, b3 = params["w3"], params["b3"]

    B, in_dim = x.shape
    h1_dim, h2_dim, out_dim = w1.shape[1], w2.shape[1], w3.shape[1]

    # Lane-dense padded feature dims.
    in_p = _round_up(in_dim, LANE)
    h1_p = _round_up(h1_dim, LANE)
    h2_p = _round_up(h2_dim, LANE)
    out_p = _round_up(out_dim, LANE)

    # Batch tiling: tile is a multiple of 8, capped at MAX_TILE_B; batch is
    # zero-padded up to a whole number of tiles.
    tile_b = min(MAX_TILE_B, _round_up(B, SUBLANE))
    b_pad = _round_up(B, tile_b)
    num_tiles = b_pad // tile_b

    # Pad + cast operands. bf16 for matmul operands (x, W); biases stay f32
    # since they are added to the f32 accumulator.
    xp = _pad_to(x, (b_pad, in_p)).astype(jnp.bfloat16)
    w1p = _pad_to(w1, (in_p, h1_p)).astype(jnp.bfloat16)
    w2p = _pad_to(w2, (h1_p, h2_p)).astype(jnp.bfloat16)
    w3p = _pad_to(w3, (h2_p, out_p)).astype(jnp.bfloat16)
    b1p = _pad_to(b1, (1, h1_p))
    b2p = _pad_to(b2, (1, h2_p))
    b3p = _pad_to(b3, (1, out_p))

    resident = lambda shape: pl.BlockSpec(shape, lambda i: (0, 0))

    out_padded = pl.pallas_call(
        teacher_mlp_kernel,
        out_shape=jax.ShapeDtypeStruct((b_pad, out_p), jnp.float32),
        grid=(num_tiles,),
        in_specs=[
            pl.BlockSpec((tile_b, in_p), lambda i: (i, 0)),   # x: streamed
            resident((in_p, h1_p)), resident((1, h1_p)),      # w1, b1: resident
            resident((h1_p, h2_p)), resident((1, h2_p)),      # w2, b2
            resident((h2_p, out_p)), resident((1, out_p)),    # w3, b3
        ],
        out_specs=pl.BlockSpec((tile_b, out_p), lambda i: (i, 0)),
        compiler_params=pltpu.CompilerParams(
            dimension_semantics=("parallel",)),
    )(xp, w1p, b1p, w2p, b2p, w3p, b3p)

    return out_padded[:B, :out_dim]


def init_params(key, input_dim=10, hidden_dim=100, output_dim=2):
    """Deterministic init mimicking PyTorch nn.Linear default
    (uniform +/- 1/sqrt(fan_in)). Weights stored [in, out], biases [1, out]."""
    dims = [(input_dim, hidden_dim),
            (hidden_dim, hidden_dim // 2),
            (hidden_dim // 2, output_dim)]
    params = {}
    for i, (fan_in, fan_out) in enumerate(dims, start=1):
        key, kw, kb = jax.random.split(key, 3)
        bound = 1.0 / (fan_in ** 0.5)
        params[f"w{i}"] = jax.random.uniform(
            kw, (fan_in, fan_out), jnp.float32, minval=-bound, maxval=bound)
        params[f"b{i}"] = jax.random.uniform(
            kb, (1, fan_out), jnp.float32, minval=-bound, maxval=bound)
    return params


def _ref_forward(x, params, matmul_dtype):
    """Pure-JAX reference with the same operand dtype as the kernel."""
    c = lambda a: a.astype(matmul_dtype)
    h = jnp.dot(c(x), c(params["w1"]),
                preferred_element_type=jnp.float32) + params["b1"]
    h = jnp.maximum(h, 0.0)
    h = jnp.dot(c(h), c(params["w2"]),
                preferred_element_type=jnp.float32) + params["b2"]
    h = jnp.maximum(h, 0.0)
    return jnp.dot(c(h), c(params["w3"]),
                   preferred_element_type=jnp.float32) + params["b3"]


if __name__ == "__main__":
    key = jax.random.PRNGKey(0)
    key, kx = jax.random.split(key)

    input_dim, hidden_dim, output_dim = 10, 100, 2
    batch = 8

    params = init_params(key, input_dim, hidden_dim, output_dim)
    x = jax.random.normal(kx, (batch, input_dim), dtype=jnp.float32)

    out = teacher_model_forward(x, params)
    out = jax.block_until_ready(out)
    assert out.shape == (batch, output_dim)

    # Tight check against a reference that uses the same bf16 matmul operands.
    ref_bf16 = _ref_forward(x, params, jnp.bfloat16)
    assert jnp.allclose(out, ref_bf16, atol=1e-3, rtol=1e-3), (
        jnp.max(jnp.abs(out - ref_bf16)))

    # Loose check against the full-f32 reference (bf16 operand quantization).
    ref_f32 = _ref_forward(x, params, jnp.float32)
    assert jnp.allclose(out, ref_f32, atol=5e-2, rtol=5e-2), (
        jnp.max(jnp.abs(out - ref_f32)))

    print("KERNEL_OK")
</pallas_src>

<mosaic_0001>
module attributes {stable_mosaic.version = 11 : i64} {
  func.func @teacher_mlp_kernel(%arg0: i32, %arg1: memref<8x128xbf16, #tpu.memory_space<vmem>>, %arg2: memref<128x128xbf16, #tpu.memory_space<vmem>>, %arg3: memref<1x128xf32, #tpu.memory_space<vmem>>, %arg4: memref<128x128xbf16, #tpu.memory_space<vmem>>, %arg5: memref<1x128xf32, #tpu.memory_space<vmem>>, %arg6: memref<128x128xbf16, #tpu.memory_space<vmem>>, %arg7: memref<1x128xf32, #tpu.memory_space<vmem>>, %arg8: memref<8x128xf32, #tpu.memory_space<vmem>>) attributes {dimension_semantics = [#tpu.dimension_semantics<parallel>], iteration_bounds = array<i64: 1>, scalar_prefetch = 0 : i64, scratch_operands = 0 : i64, tpu.core_type = #tpu.core_type<tc>, window_params = [{transform_indices = @transform_0, window_bounds = array<i64: 8, 128>}, {pipeline_mode = #tpu.pipeline_mode<synchronous>, transform_indices = @transform_1, window_bounds = array<i64: 128, 128>}, {pipeline_mode = #tpu.pipeline_mode<synchronous>, transform_indices = @transform_2, window_bounds = array<i64: 1, 128>}, {pipeline_mode = #tpu.pipeline_mode<synchronous>, transform_indices = @transform_3, window_bounds = array<i64: 128, 128>}, {pipeline_mode = #tpu.pipeline_mode<synchronous>, transform_indices = @transform_4, window_bounds = array<i64: 1, 128>}, {pipeline_mode = #tpu.pipeline_mode<synchronous>, transform_indices = @transform_5, window_bounds = array<i64: 128, 128>}, {pipeline_mode = #tpu.pipeline_mode<synchronous>, transform_indices = @transform_6, window_bounds = array<i64: 1, 128>}, {transform_indices = @transform_7, window_bounds = array<i64: 8, 128>}]} {
    %c0 = arith.constant 0 : index
    %c0_0 = arith.constant 0 : index
    %0 = vector.load %arg1[%c0, %c0_0] : memref<8x128xbf16, #tpu.memory_space<vmem>>, vector<8x128xbf16>
    %c0_1 = arith.constant 0 : index
    %c0_2 = arith.constant 0 : index
    %1 = vector.load %arg2[%c0_1, %c0_2] : memref<128x128xbf16, #tpu.memory_space<vmem>>, vector<128x128xbf16>
    %cst = arith.constant dense<0.000000e+00> : vector<8x128xf32>
    %2 = tpu.matmul %0, %1, %cst {dimension_numbers = #tpu.dot_dimension_numbers<[1], [0], [0], [1], [0, 0, 1, 1], [], []>} : vector<8x128xbf16>, vector<128x128xbf16>, vector<8x128xf32> -> vector<8x128xf32>
    %c0_3 = arith.constant 0 : index
    %c0_4 = arith.constant 0 : index
    %3 = vector.load %arg3[%c0_3, %c0_4] : memref<1x128xf32, #tpu.memory_space<vmem>>, vector<1x128xf32>
    %4 = vector.broadcast %3 : vector<1x128xf32> to vector<8x128xf32>
    %5 = arith.addf %2, %4 : vector<8x128xf32>
    %cst_5 = arith.constant 0.000000e+00 : f32
    %6 = vector.broadcast %cst_5 : f32 to vector<8x128xf32>
    %7 = arith.maximumf %5, %6 : vector<8x128xf32>
    %8 = arith.truncf %7 : vector<8x128xf32> to vector<8x128xbf16>
    %c0_6 = arith.constant 0 : index
    %c0_7 = arith.constant 0 : index
    %9 = vector.load %arg4[%c0_6, %c0_7] : memref<128x128xbf16, #tpu.memory_space<vmem>>, vector<128x128xbf16>
    %cst_8 = arith.constant dense<0.000000e+00> : vector<8x128xf32>
    %10 = tpu.matmul %8, %9, %cst_8 {dimension_numbers = #tpu.dot_dimension_numbers<[1], [0], [0], [1], [0, 0, 1, 1], [], []>} : vector<8x128xbf16>, vector<128x128xbf16>, vector<8x128xf32> -> vector<8x128xf32>
    %c0_9 = arith.constant 0 : index
    %c0_10 = arith.constant 0 : index
    %11 = vector.load %arg5[%c0_9, %c0_10] : memref<1x128xf32, #tpu.memory_space<vmem>>, vector<1x128xf32>
    %12 = vector.broadcast %11 : vector<1x128xf32> to vector<8x128xf32>
    %13 = arith.addf %10, %12 : vector<8x128xf32>
    %cst_11 = arith.constant 0.000000e+00 : f32
    %14 = vector.broadcast %cst_11 : f32 to vector<8x128xf32>
    %15 = arith.maximumf %13, %14 : vector<8x128xf32>
    %16 = arith.truncf %15 : vector<8x128xf32> to vector<8x128xbf16>
    %c0_12 = arith.constant 0 : index
    %c0_13 = arith.constant 0 : index
    %17 = vector.load %arg6[%c0_12, %c0_13] : memref<128x128xbf16, #tpu.memory_space<vmem>>, vector<128x128xbf16>
    %cst_14 = arith.constant dense<0.000000e+00> : vector<8x128xf32>
    %18 = tpu.matmul %16, %17, %cst_14 {dimension_numbers = #tpu.dot_dimension_numbers<[1], [0], [0], [1], [0, 0, 1, 1], [], []>} : vector<8x128xbf16>, vector<128x128xbf16>, vector<8x128xf32> -> vector<8x128xf32>
    %c0_15 = arith.constant 0 : index
    %c0_16 = arith.constant 0 : index
    %19 = vector.load %arg7[%c0_15, %c0_16] : memref<1x128xf32, #tpu.memory_space<vmem>>, vector<1x128xf32>
    %20 = vector.broadcast %19 : vector<1x128xf32> to vector<8x128xf32>
    %21 = arith.addf %18, %20 : vector<8x128xf32>
    %c0_17 = arith.constant 0 : index
    %c0_18 = arith.constant 0 : index
    %22 = vector.load %arg8[%c0_17, %c0_18] : memref<8x128xf32, #tpu.memory_space<vmem>>, vector<8x128xf32>
    tpu.vector_store %arg8[%c0_17, %c0_18], %21 {strides = array<i32>} : memref<8x128xf32, #tpu.memory_space<vmem>>, vector<8x128xf32>,
    return
  }
  func.func @transform_0(%arg0: i32) -> (i32, i32) {
    %c0_i32 = arith.constant 0 : i32
    %c0_i32_0 = arith.constant 0 : i32
    return %arg0, %c0_i32 : i32, i32
  }
  func.func @transform_1(%arg0: i32) -> (i32, i32) {
    %c0_i32 = arith.constant 0 : i32
    %c0_i32_0 = arith.constant 0 : i32
    %c0_i32_1 = arith.constant 0 : i32
    return %c0_i32, %c0_i32_0 : i32, i32
  }
  func.func @transform_2(%arg0: i32) -> (i32, i32) {
    %c0_i32 = arith.constant 0 : i32
    %c0_i32_0 = arith.constant 0 : i32
    %c0_i32_1 = arith.constant 0 : i32
    return %c0_i32, %c0_i32_0 : i32, i32
  }
  func.func @transform_3(%arg0: i32) -> (i32, i32) {
    %c0_i32 = arith.constant 0 : i32
    %c0_i32_0 = arith.constant 0 : i32
    %c0_i32_1 = arith.constant 0 : i32
    return %c0_i32, %c0_i32_0 : i32, i32
  }
  func.func @transform_4(%arg0: i32) -> (i32, i32) {
    %c0_i32 = arith.constant 0 : i32
    %c0_i32_0 = arith.constant 0 : i32
    %c0_i32_1 = arith.constant 0 : i32
    return %c0_i32, %c0_i32_0 : i32, i32
  }
  func.func @transform_5(%arg0: i32) -> (i32, i32) {
    %c0_i32 = arith.constant 0 : i32
    %c0_i32_0 = arith.constant 0 : i32
    %c0_i32_1 = arith.constant 0 : i32
    return %c0_i32, %c0_i32_0 : i32, i32
  }
  func.func @transform_6(%arg0: i32) -> (i32, i32) {
    %c0_i32 = arith.constant 0 : i32
    %c0_i32_0 = arith.constant 0 : i32
    %c0_i32_1 = arith.constant 0 : i32
    return %c0_i32, %c0_i32_0 : i32, i32
  }
  func.func @transform_7(%arg0: i32) -> (i32, i32) {
    %c0_i32 = arith.constant 0 : i32
    %c0_i32_0 = arith.constant 0 : i32
    return %arg0, %c0_i32 : i32, i32
  }
}

</mosaic_0001>

<bundles_post_ra>
// kernel: teacher_model_forward.1
= control target key start
LH: loop header
LB: loop body
LE: loop exit
PB: predicated region body
PF: predicated region fallthrough
CT: control target
= control target key end

     0   :  { %v510_v0 = vmov 0.0   ;;  %vm511_vm0 = vmmov 0   ;;  %s669_s1 = inlined_call_operand.vmem [shape: bf16[128,128], index: 1, kind: input, shape index: {}]   ;;  %s670_s3 = inlined_call_operand.vmem [shape: bf16[128,128], index: 3, kind: input, shape index: {}]   ;;  %s671_s0 = inlined_call_operand.vmem [shape: bf16[8,128], index: 0, kind: input, shape index: {}]   ;;  %s672_s5 = inlined_call_operand.vmem [shape: bf16[128,128], index: 5, kind: input, shape index: {}]   ;;  %s673_s2 = inlined_call_operand.vmem [shape: f32[1,128], index: 2, kind: input, shape index: {}]   ;;  %s674_s4 = inlined_call_operand.vmem [shape: f32[1,128], index: 4, kind: input, shape index: {}]   ;;  %s675_s6 = inlined_call_operand.vmem [shape: f32[1,128], index: 6, kind: input, shape index: {}]   ;;  %s676_s7 = inlined_call_operand.vmem [shape: f32[8,128], index: 7, kind: output, shape index: {}]  }
   0x1   :  { %424 = vmatprep.subr.bf16.mxu0 %v510_v0  ;;  %v486_v1 = vld [vmem:[%s669_s1 + $0x38] sm:$0xff]   ;;  %440 = vmatprep.mubr.msk.bf16.mxu0 %vm511_vm0, %v510_v0  ;;  %v487_v2 = vld [vmem:[%s669_s1 + $0x30] sm:$0xff]   ;;  %v488_v3 = vld [vmem:[%s669_s1 + $0x28] sm:$0xff]  }
   0x2   :  { %444 = vmatprep.subr.bf16.mxu1 %v510_v0  ;;  %460 = vmatprep.mubr.msk.bf16.mxu1 %vm511_vm0, %v510_v0  ;;  %v494_v4 = vld [vmem:[%s670_s3 + $0x38] sm:$0xff]   ;;  %v489_v5 = vld [vmem:[%s669_s1 + $0x20] sm:$0xff]   ;;  %v495_v6 = vld [vmem:[%s670_s3 + $0x30] sm:$0xff]  }
   0x3   :  { %425 = vmatpush3.bf16.msra.mxu0 %v486_v1  ;;  %445 = vmatpush3.bf16.msra.mxu1 %v494_v4  ;;  %v490_v7 = vld [vmem:[%s669_s1 + $0x18] sm:$0xff]   ;;  %v496_v8 = vld [vmem:[%s670_s3 + $0x28] sm:$0xff]   ;;  %v491_v9 = vld [vmem:[%s669_s1 + $0x10] sm:$0xff]  }
   0x4   :  { %426 = vmatprep.subr.bf16.mxu0 %v510_v0  ;;  %446 = vmatprep.subr.bf16.mxu1 %v510_v0  ;;  %v497_v10 = vld [vmem:[%s670_s3 + $0x20] sm:$0xff]   ;;  %v492_v11 = vld [vmem:[%s669_s1 + $0x8] sm:$0xff]   ;;  %v498_v12 = vld [vmem:[%s670_s3 + $0x18] sm:$0xff]  }
   0x5   :  { %v493_v13 = vld [vmem:[%s669_s1] sm:$0xff]   ;;  %v499_v14 = vld [vmem:[%s670_s3 + $0x10] sm:$0xff]   ;;  %v500_v16 = vld [vmem:[%s670_s3 + $0x8] sm:$0xff]  }
   0x6   :  { %v27_v15 = vld [vmem:[%s671_s0] sm:$0xf]  ;;  %v502_v18 = vld [vmem:[%s672_s5 + $0x38] sm:$0xff]   ;;  %v503_v19 = vld [vmem:[%s672_s5 + $0x30] sm:$0xff]  }
   0x7   :  { %427 = vmatpush3.bf16.msra.mxu0 %v487_v2  ;;  %447 = vmatpush3.bf16.msra.mxu1 %v495_v6  ;;  %v501_v17 = vld [vmem:[%s670_s3] sm:$0xff]   ;;  %v504_v20 = vld [vmem:[%s672_s5 + $0x28] sm:$0xff]   ;;  %v506_v22 = vld [vmem:[%s672_s5 + $0x18] sm:$0xff]  }
   0x8   :  { %428 = vmatprep.subr.bf16.mxu0 %v510_v0  ;;  %448 = vmatprep.subr.bf16.mxu1 %v510_v0  ;;  %v505_v21 = vld [vmem:[%s672_s5 + $0x20] sm:$0xff]   ;;  %v507_v23 = vld [vmem:[%s672_s5 + $0x10] sm:$0xff]   ;;  %v508_v32 = vld [vmem:[%s672_s5 + $0x8] sm:$0xff]  }
   0x9   :  { %v370_v24 = vld [vmem:[%s673_s2] ss:$0 sm:$0xff] }
   0xa   :  { %v509_v33 = vld [vmem:[%s672_s5] sm:$0xff]  }
   0xb   :  { %429 = vmatpush3.bf16.msra.mxu0 %v488_v3  ;;  %449 = vmatpush3.bf16.msra.mxu1 %v496_v8  ;;  %v379_v34 = vld [vmem:[%s674_s4] ss:$0 sm:$0xff] }
   0xc   :  { %430 = vmatprep.subr.bf16.mxu0 %v510_v0  ;;  %450 = vmatprep.subr.bf16.mxu1 %v510_v0  ;;  %v388_v42 = vld [vmem:[%s675_s6] ss:$0 sm:$0xff] }
   0xf   :  { %431 = vmatpush3.bf16.msra.mxu0 %v489_v5  ;;  %451 = vmatpush3.bf16.msra.mxu1 %v497_v10 }
  0x10   :  { %432 = vmatprep.subr.bf16.mxu0 %v510_v0  ;;  %452 = vmatprep.subr.bf16.mxu1 %v510_v0 }
  0x13   :  { %433 = vmatpush3.bf16.msra.mxu0 %v490_v7  ;;  %453 = vmatpush3.bf16.msra.mxu1 %v498_v12 }
  0x14   :  { %434 = vmatprep.subr.bf16.mxu0 %v510_v0  ;;  %454 = vmatprep.subr.bf16.mxu1 %v510_v0 }
  0x17   :  { %435 = vmatpush3.bf16.msra.mxu0 %v491_v9  ;;  %455 = vmatpush3.bf16.msra.mxu1 %v499_v14 }
  0x18   :  { %436 = vmatprep.subr.bf16.mxu0 %v510_v0  ;;  %456 = vmatprep.subr.bf16.mxu1 %v510_v0 }
  0x1b   :  { %437 = vmatpush3.bf16.msra.mxu0 %v492_v11  ;;  %457 = vmatpush3.bf16.msra.mxu1 %v500_v16 }
  0x1c   :  { %438 = vmatprep.subr.bf16.mxu0 %v510_v0  ;;  %458 = vmatprep.subr.bf16.mxu1 %v510_v0 }
  0x1f   :  { %439 = vmatpush3.bf16.msra.mxu0 %v493_v13  ;;  %459 = vmatpush3.bf16.msra.mxu1 %v501_v17 }
  0x20   :  { %464 = vmatprep.subr.bf16.mxu0 %v510_v0 }
  0x22   :  { %441 = vmatmul.mubr.bf16.vlgmr.msra.gmra.mxu0 %v27_v15 }
  0x23   :  { %480 = vmatprep.mubr.msk.bf16.mxu0 %vm511_vm0, %v510_v0  ;;  %465 = vmatpush3.bf16.msra.mxu0 %v502_v18 }
  0x24   :  { %466 = vmatprep.subr.bf16.mxu0 %v510_v0 }
  0x27   :  { %467 = vmatpush3.bf16.msra.mxu0 %v503_v19 }
  0x28   :  { %468 = vmatprep.subr.bf16.mxu0 %v510_v0 }
  0x2b   :  { %469 = vmatpush3.bf16.msra.mxu0 %v504_v20 }
  0x2c   :  { %470 = vmatprep.subr.bf16.mxu0 %v510_v0 }
  0x2f   :  { %471 = vmatpush3.bf16.msra.mxu0 %v505_v21 }
  0x30   :  { %472 = vmatprep.subr.bf16.mxu0 %v510_v0 }
  0x33   :  { %473 = vmatpush3.bf16.msra.mxu0 %v506_v22 }
  0x34   :  { %474 = vmatprep.subr.bf16.mxu0 %v510_v0 }
  0x37   :  { %475 = vmatpush3.bf16.msra.mxu0 %v507_v23 }
  0x38   :  { %476 = vmatprep.subr.bf16.mxu0 %v510_v0 }
  0x3b   :  { %477 = vmatpush3.bf16.msra.mxu0 %v508_v32 }
  0x3c   :  { %478 = vmatprep.subr.bf16.mxu0 %v510_v0 }
  0x3f   :  { %479 = vmatpush3.bf16.msra.mxu0 %v509_v33 }
  0xe2   :  { %v133_v25 = vpop.f32.mrf.mxu0 }
  0xe3   :  { %v134_v26 = vadd.f32 %v370_v24, %v133_v25 }
  0xe4   :  { %v442_v27 = vpop.f32.mrf.mxu0 }
  0xe5   :  { %v139_v28 = vmax.f32 %v134_v26, 0.0 }
  0xe6   :  { %v136_v29 = vpop.f32.mrf.mxu0 }
  0xe7   :  { %v140_v30 = vpack.c.bf16 %v139_v28, %v139_v28 }
  0xe8   :  { %v443_v31 = vpop.f32.mrf.mxu0 }
  0xe9   :  { %461 = vmatmul.mubr.bf16.vlgmr.msra.gmra.mxu1 %v140_v30 }
 0x1a9   :  { %v246_v35 = vpop.f32.mrf.mxu1 }
 0x1aa   :  { %v247_v36 = vadd.f32 %v379_v34, %v246_v35 }
 0x1ab   :  { %v462_v37 = vpop.f32.mrf.mxu1 }
 0x1ac   :  { %v252_v38 = vmax.f32 %v247_v36, 0.0 }
 0x1ad   :  { %v249_v39 = vpop.f32.mrf.mxu1 }
 0x1ae   :  { %v253_v40 = vpack.c.bf16 %v252_v38, %v252_v38 }
 0x1af   :  { %v463_v41 = vpop.f32.mrf.mxu1 }
 0x1b0   :  { %481 = vmatmul.mubr.bf16.vlgmr.msra.gmra.mxu0 %v253_v40 }
 0x270   :  { %v359_v43 = vpop.f32.mrf.mxu0 }
 0x271   :  { %v360_v44 = vadd.f32 %v388_v42, %v359_v43 }
 0x272   :  { %v482_v45 = vpop.f32.mrf.mxu0 }
 0x273   :  { %365 = vst [vmem:[%s676_s7] sm:$0xff] %v360_v44 }
 0x274   :  { %v362_v46 = vpop.f32.mrf.mxu0 }
 0x276   :  { %v483_v47 = vpop.f32.mrf.mxu0 }

</bundles_post_ra>
